<compile_context>
chip_gen: v6e
topology: v6e:2x2x1
jax: 0.10.0
libtpu: 0.0.40
codegen_flags: <defaults>
</compile_context>

<pallas_src>
import jax
import jax.numpy as jnp
from jax import lax
from jax.experimental import pallas as pl
from jax.experimental.pallas import tpu as pltpu

LN_EPS = 1e-5


def _round_up(v, m):
    return ((v + m - 1) // m) * m


def _pick_tb(batch):
    """Batch-tile size: single tile for small batches; >=2 tiles once the
    batch is moderate (both v7x TensorCores busy); cap at 512 rows."""
    b8 = _round_up(batch, 8)
    if b8 <= 256:
        return b8
    if b8 <= 1024:
        return _round_up((b8 + 1) // 2, 8)
    return 512


def _vmem_cap_bytes():
    try:
        return int(pltpu.get_tpu_info().vmem_capacity_bytes)
    except Exception:
        return 64 << 20          # conservative default (v7x per-TC VMEM)


# ---------------------------------------------------------------------------
# Fused kernel: Linear -> LayerNorm -> ReLU (x num_hidden) -> Linear
# ---------------------------------------------------------------------------
def _make_fused_mlp_kernel(hidden_true_dims):
    """Kernel ref layout (positional):
        x_ref, [w_i, bgb_i] * num_hidden, w_last, b_last, o_ref
    bgb_i is (4, Npad) f32: [bias; gamma; beta; lane_mask] (zero-padded).
    All feature dims are padded to multiples of 128; padded lanes of every
    intermediate are exactly zero by construction.
    """
    num_hidden = len(hidden_true_dims)

    def kernel(*refs):
        x_ref = refs[0]
        o_ref = refs[-1]

        h = x_ref[...]                                   # (TB, D0p) bf16
        r = 1
        for li in range(num_hidden):
            w_ref, bgb_ref = refs[r], refs[r + 1]
            r += 2

            # MXU matmul: bf16 operands, f32 accumulation.
            y = jnp.dot(h, w_ref[...], preferred_element_type=jnp.float32)
            y = y + bgb_ref[0:1, :]                      # bias (padded lanes 0)

            # LayerNorm over the TRUE feature count.  Padded lanes of y are
            # exactly zero, so the mean is correct as-is; the variance uses
            # the precomputed lane-mask row (no iota/compare/where).
            true_n = hidden_true_dims[li]
            n_pad = y.shape[-1]
            inv_n = 1.0 / true_n
            mean = jnp.sum(y, axis=-1, keepdims=True) * inv_n
            centered = y - mean
            cen_m = centered if true_n == n_pad else centered * bgb_ref[3:4, :]
            var = jnp.sum(cen_m * cen_m, axis=-1, keepdims=True) * inv_n
            y = centered * lax.rsqrt(var + LN_EPS)
            # gamma/beta padded lanes are zero -> padded lanes stay exactly 0.
            y = y * bgb_ref[1:2, :] + bgb_ref[2:3, :]

            # ReLU; carry inter-layer activation in bf16 (MXU operand dtype).
            h = jnp.maximum(y, 0.0).astype(jnp.bfloat16)

        # Final Linear (no norm / activation), f32 accumulation + bias.
        w_ref, b_ref = refs[r], refs[r + 1]
        y = jnp.dot(h, w_ref[...], preferred_element_type=jnp.float32)
        o_ref[...] = (y + b_ref[...]).astype(o_ref.dtype)

    return kernel


# ---------------------------------------------------------------------------
# One-time weight packing (hoisted out of the per-call path)
# ---------------------------------------------------------------------------
def _pack_params(params, dims_p):
    num_hidden = len(params) - 1
    packed = []
    for li in range(num_hidden):
        p = params[li]
        n_in, n_out = p["w"].shape
        w_p = jnp.zeros((dims_p[li], dims_p[li + 1]), jnp.bfloat16)
        w_p = w_p.at[:n_in, :n_out].set(p["w"].astype(jnp.bfloat16))
        bgb = jnp.zeros((4, dims_p[li + 1]), jnp.float32)
        bgb = bgb.at[0, :n_out].set(p["b"].reshape(-1))
        bgb = bgb.at[1, :n_out].set(p["gamma"].reshape(-1))
        bgb = bgb.at[2, :n_out].set(p["beta"].reshape(-1))
        bgb = bgb.at[3, :n_out].set(1.0)                 # LN variance lane mask
        packed += [w_p, bgb]
    p = params[-1]
    n_in, n_out = p["w"].shape
    w_p = jnp.zeros((dims_p[-2], dims_p[-1]), jnp.bfloat16)
    w_p = w_p.at[:n_in, :n_out].set(p["w"].astype(jnp.bfloat16))
    b_p = jnp.zeros((1, dims_p[-1]), jnp.float32).at[0, :n_out].set(
        p["b"].reshape(-1))
    packed += [w_p, b_p]
    return tuple(packed)


# ---------------------------------------------------------------------------
# Factory: packs weights once, returns a jitted forward(x)
# ---------------------------------------------------------------------------
def make_feedforward(params):
    d_in = params[0]["w"].shape[0]
    dims = [d_in] + [p["w"].shape[1] for p in params]          # true widths
    dims_p = [_round_up(d, 128) for d in dims]                 # lane-dense widths
    hidden_true = tuple(dims[1:-1])
    d_out = dims[-1]

    packed = _pack_params(params, dims_p)                      # packed ONCE
    kernel = _make_fused_mlp_kernel(hidden_true)
    vmem_cap = _vmem_cap_bytes()
    weight_bytes = sum(int(q.size) * q.dtype.itemsize for q in packed)

    def build(single_buffer_weights):
        def const_spec(shape):
            idx = lambda i: (0,) * len(shape)
            if single_buffer_weights:
                return pl.BlockSpec(shape, idx, pipeline_mode=pl.Buffered(1))
            return pl.BlockSpec(shape, idx)

        @jax.jit
        def fwd(x, *ops):
            batch, xin = x.shape
            tb = _pick_tb(batch)
            b_pad = _round_up(batch, tb)

            # Pad input into a bf16 lane-dense buffer (halves input DMA).
            if b_pad == batch and dims_p[0] == xin:
                x_p = x.astype(jnp.bfloat16)
            else:
                x_p = jnp.zeros((b_pad, dims_p[0]), jnp.bfloat16)
                x_p = x_p.at[:batch, :xin].set(x.astype(jnp.bfloat16))

            in_specs = [pl.BlockSpec((tb, dims_p[0]), lambda i: (i, 0))]
            for q in ops:
                in_specs.append(const_spec(q.shape))

            # Derive the VMEM budget from operand sizes: resident weights
            # (x2 if double-buffered), pipelined x/out tiles, activation
            # temporaries; 1.5x slack; clamped to ~75% of physical VMEM.
            wfac = 1 if single_buffer_weights else 2
            io_bytes = tb * dims_p[0] * 2 + tb * dims_p[-1] * 4
            act_bytes = tb * max(dims_p) * 4
            need = wfac * weight_bytes + 2 * io_bytes + 6 * act_bytes
            need = need + need // 2 + (4 << 20)
            vmem_limit = min(max(int(need), 32 << 20),
                             max(32 << 20, (vmem_cap * 3) // 4))
            # TODO(synk): if resident weights alone exceed this budget, switch
            # to a K/N-tiled grid that streams weight blocks instead of the
            # all-resident fused design.

            out_p = pl.pallas_call(
                kernel,
                out_shape=jax.ShapeDtypeStruct((b_pad, dims_p[-1]), jnp.float32),
                grid=(b_pad // tb,),
                in_specs=in_specs,
                out_specs=pl.BlockSpec((tb, dims_p[-1]), lambda i: (i, 0)),
                compiler_params=pltpu.CompilerParams(
                    dimension_semantics=("parallel",),   # megacore on v7x
                    vmem_limit_bytes=int(vmem_limit),
                ),
            )(x_p, *ops)

            # Strip batch / feature padding.
            return out_p[:batch, :d_out]

        return lambda x: fwd(x, *packed)

    forward = build(True)
    # One-shot probe: verify single-buffered weight specs compile on this
    # jax/libtpu; otherwise fall back to default double-buffering.
    try:
        jax.block_until_ready(forward(jnp.zeros((8, d_in), jnp.float32)))
    except Exception:
        forward = build(False)
    return forward


# ---------------------------------------------------------------------------
# Parameter construction + pure-JAX reference
# ---------------------------------------------------------------------------
def init_feedforward_params(key, layer_sizes):
    """Deterministic synthetic init (shapes match the PyTorch module)."""
    params = []
    n_layers = len(layer_sizes) - 1
    keys = jax.random.split(key, 2 * n_layers)
    for i in range(1, len(layer_sizes) - 1):
        fan_in, fan_out = layer_sizes[i - 1], layer_sizes[i]
        kw, kb = keys[2 * (i - 1)], keys[2 * (i - 1) + 1]
        w = (jax.random.normal(kw, (fan_in, fan_out), jnp.float32)
             / jnp.sqrt(jnp.float32(fan_in)))
        b = 0.01 * jax.random.normal(kb, (1, fan_out), jnp.float32)
        gamma = jnp.ones((1, fan_out), jnp.float32)
        beta = jnp.zeros((1, fan_out), jnp.float32)
        params.append({"w": w, "b": b, "gamma": gamma, "beta": beta})
    fan_in, fan_out = layer_sizes[-2], layer_sizes[-1]
    kw, kb = keys[-2], keys[-1]
    w = (jax.random.normal(kw, (fan_in, fan_out), jnp.float32)
         / jnp.sqrt(jnp.float32(fan_in)))
    b = 0.01 * jax.random.normal(kb, (1, fan_out), jnp.float32)
    params.append({"w": w, "b": b})
    return params


def feedforward_ref(params, x):
    """Pure-JAX reference mirroring the kernel numerics (bf16 MXU operands,
    f32 accumulation, f32 LayerNorm/ReLU)."""
    h = x
    for p in params[:-1]:
        y = jnp.dot(h.astype(jnp.bfloat16), p["w"].astype(jnp.bfloat16),
                    preferred_element_type=jnp.float32) + p["b"]
        mean = jnp.mean(y, axis=-1, keepdims=True)
        var = jnp.mean((y - mean) ** 2, axis=-1, keepdims=True)
        y = (y - mean) * lax.rsqrt(var + LN_EPS)
        y = y * p["gamma"] + p["beta"]
        h = jnp.maximum(y, 0.0)
    p = params[-1]
    return jnp.dot(h.astype(jnp.bfloat16), p["w"].astype(jnp.bfloat16),
                   preferred_element_type=jnp.float32) + p["b"]


# ---------------------------------------------------------------------------
if __name__ == "__main__":
    key = jax.random.PRNGKey(0)
    k_params, k_x = jax.random.split(key)

    layer_sizes = [32, 64, 48, 16]   # in -> hidden -> hidden -> out
    batch = 8

    params = init_feedforward_params(k_params, layer_sizes)
    x = jax.random.normal(k_x, (batch, layer_sizes[0]), jnp.float32)

    forward = make_feedforward(params)          # packs weights ONCE
    out = jax.block_until_ready(forward(x))

    ref = feedforward_ref(params, x)
    assert out.shape == (batch, layer_sizes[-1])
    assert jnp.allclose(out, ref, atol=1e-3, rtol=1e-3), "mismatch vs reference"

    print("KERNEL_OK")
</pallas_src>

<mosaic_0001>
module attributes {stable_mosaic.version = 11 : i64} {
  func.func @kernel(%arg0: i32, %arg1: memref<8x128xbf16, #tpu.memory_space<vmem>>, %arg2: memref<128x128xbf16, #tpu.memory_space<vmem>>, %arg3: memref<4x128xf32, #tpu.memory_space<vmem>>, %arg4: memref<128x128xbf16, #tpu.memory_space<vmem>>, %arg5: memref<4x128xf32, #tpu.memory_space<vmem>>, %arg6: memref<128x128xbf16, #tpu.memory_space<vmem>>, %arg7: memref<1x128xf32, #tpu.memory_space<vmem>>, %arg8: memref<8x128xf32, #tpu.memory_space<vmem>>) attributes {dimension_semantics = [#tpu.dimension_semantics<parallel>], iteration_bounds = array<i64: 1>, scalar_prefetch = 0 : i64, scratch_operands = 0 : i64, tpu.core_type = #tpu.core_type<tc>, window_params = [{transform_indices = @transform_0, window_bounds = array<i64: 8, 128>}, {pipeline_mode = #tpu.pipeline_mode<synchronous>, transform_indices = @transform_1, window_bounds = array<i64: 128, 128>}, {pipeline_mode = #tpu.pipeline_mode<synchronous>, transform_indices = @transform_2, window_bounds = array<i64: 4, 128>}, {pipeline_mode = #tpu.pipeline_mode<synchronous>, transform_indices = @transform_3, window_bounds = array<i64: 128, 128>}, {pipeline_mode = #tpu.pipeline_mode<synchronous>, transform_indices = @transform_4, window_bounds = array<i64: 4, 128>}, {pipeline_mode = #tpu.pipeline_mode<synchronous>, transform_indices = @transform_5, window_bounds = array<i64: 128, 128>}, {pipeline_mode = #tpu.pipeline_mode<synchronous>, transform_indices = @transform_6, window_bounds = array<i64: 1, 128>}, {transform_indices = @transform_7, window_bounds = array<i64: 8, 128>}]} {
    %c0 = arith.constant 0 : index
    %c0_0 = arith.constant 0 : index
    %0 = vector.load %arg1[%c0, %c0_0] : memref<8x128xbf16, #tpu.memory_space<vmem>>, vector<8x128xbf16>
    %c0_1 = arith.constant 0 : index
    %c0_2 = arith.constant 0 : index
    %1 = vector.load %arg2[%c0_1, %c0_2] : memref<128x128xbf16, #tpu.memory_space<vmem>>, vector<128x128xbf16>
    %cst = arith.constant dense<0.000000e+00> : vector<8x128xf32>
    %2 = tpu.matmul %0, %1, %cst {dimension_numbers = #tpu.dot_dimension_numbers<[1], [0], [0], [1], [0, 0, 1, 1], [], []>} : vector<8x128xbf16>, vector<128x128xbf16>, vector<8x128xf32> -> vector<8x128xf32>
    %c0_3 = arith.constant 0 : index
    %c0_4 = arith.constant 0 : index
    %3 = vector.load %arg3[%c0_3, %c0_4] : memref<4x128xf32, #tpu.memory_space<vmem>>, vector<1x128xf32>
    %4 = vector.broadcast %3 : vector<1x128xf32> to vector<8x128xf32>
    %5 = arith.addf %2, %4 : vector<8x128xf32>
    %cst_5 = arith.constant dense<0.000000e+00> : vector<8xf32>
    %6 = vector.multi_reduction <add>, %5, %cst_5 [1] : vector<8x128xf32> to vector<8xf32>
    %7 = vector.shape_cast %6 : vector<8xf32> to vector<8x1xf32>
    %cst_6 = arith.constant 1.562500e-02 : f32
    %8 = vector.broadcast %cst_6 : f32 to vector<8x1xf32>
    %9 = arith.mulf %7, %8 : vector<8x1xf32>
    %10 = vector.broadcast %9 : vector<8x1xf32> to vector<8x128xf32>
    %11 = arith.subf %5, %10 : vector<8x128xf32>
    %c3 = arith.constant 3 : index
    %c0_7 = arith.constant 0 : index
    %12 = vector.load %arg3[%c3, %c0_7] : memref<4x128xf32, #tpu.memory_space<vmem>>, vector<1x128xf32>
    %13 = vector.broadcast %12 : vector<1x128xf32> to vector<8x128xf32>
    %14 = arith.mulf %11, %13 : vector<8x128xf32>
    %15 = arith.mulf %14, %14 : vector<8x128xf32>
    %cst_8 = arith.constant dense<0.000000e+00> : vector<8xf32>
    %16 = vector.multi_reduction <add>, %15, %cst_8 [1] : vector<8x128xf32> to vector<8xf32>
    %17 = vector.shape_cast %16 : vector<8xf32> to vector<8x1xf32>
    %cst_9 = arith.constant 1.562500e-02 : f32
    %18 = vector.broadcast %cst_9 : f32 to vector<8x1xf32>
    %19 = arith.mulf %17, %18 : vector<8x1xf32>
    %cst_10 = arith.constant 9.99999974E-6 : f32
    %20 = vector.broadcast %cst_10 : f32 to vector<8x1xf32>
    %21 = arith.addf %19, %20 : vector<8x1xf32>
    %22 = math.rsqrt %21 : vector<8x1xf32>
    %23 = vector.broadcast %22 : vector<8x1xf32> to vector<8x128xf32>
    %24 = arith.mulf %11, %23 : vector<8x128xf32>
    %c1 = arith.constant 1 : index
    %c0_11 = arith.constant 0 : index
    %25 = vector.load %arg3[%c1, %c0_11] : memref<4x128xf32, #tpu.memory_space<vmem>>, vector<1x128xf32>
    %26 = vector.broadcast %25 : vector<1x128xf32> to vector<8x128xf32>
    %27 = arith.mulf %24, %26 : vector<8x128xf32>
    %c2 = arith.constant 2 : index
    %c0_12 = arith.constant 0 : index
    %28 = vector.load %arg3[%c2, %c0_12] : memref<4x128xf32, #tpu.memory_space<vmem>>, vector<1x128xf32>
    %29 = vector.broadcast %28 : vector<1x128xf32> to vector<8x128xf32>
    %30 = arith.addf %27, %29 : vector<8x128xf32>
    %cst_13 = arith.constant 0.000000e+00 : f32
    %31 = vector.broadcast %cst_13 : f32 to vector<8x128xf32>
    %32 = arith.maximumf %30, %31 : vector<8x128xf32>
    %33 = arith.truncf %32 : vector<8x128xf32> to vector<8x128xbf16>
    %c0_14 = arith.constant 0 : index
    %c0_15 = arith.constant 0 : index
    %34 = vector.load %arg4[%c0_14, %c0_15] : memref<128x128xbf16, #tpu.memory_space<vmem>>, vector<128x128xbf16>
    %cst_16 = arith.constant dense<0.000000e+00> : vector<8x128xf32>
    %35 = tpu.matmul %33, %34, %cst_16 {dimension_numbers = #tpu.dot_dimension_numbers<[1], [0], [0], [1], [0, 0, 1, 1], [], []>} : vector<8x128xbf16>, vector<128x128xbf16>, vector<8x128xf32> -> vector<8x128xf32>
    %c0_17 = arith.constant 0 : index
    %c0_18 = arith.constant 0 : index
    %36 = vector.load %arg5[%c0_17, %c0_18] : memref<4x128xf32, #tpu.memory_space<vmem>>, vector<1x128xf32>
    %37 = vector.broadcast %36 : vector<1x128xf32> to vector<8x128xf32>
    %38 = arith.addf %35, %37 : vector<8x128xf32>
    %cst_19 = arith.constant dense<0.000000e+00> : vector<8xf32>
    %39 = vector.multi_reduction <add>, %38, %cst_19 [1] : vector<8x128xf32> to vector<8xf32>
    %40 = vector.shape_cast %39 : vector<8xf32> to vector<8x1xf32>
    %cst_20 = arith.constant 0.020833334 : f32
    %41 = vector.broadcast %cst_20 : f32 to vector<8x1xf32>
    %42 = arith.mulf %40, %41 : vector<8x1xf32>
    %43 = vector.broadcast %42 : vector<8x1xf32> to vector<8x128xf32>
    %44 = arith.subf %38, %43 : vector<8x128xf32>
    %c3_21 = arith.constant 3 : index
    %c0_22 = arith.constant 0 : index
    %45 = vector.load %arg5[%c3_21, %c0_22] : memref<4x128xf32, #tpu.memory_space<vmem>>, vector<1x128xf32>
    %46 = vector.broadcast %45 : vector<1x128xf32> to vector<8x128xf32>
    %47 = arith.mulf %44, %46 : vector<8x128xf32>
    %48 = arith.mulf %47, %47 : vector<8x128xf32>
    %cst_23 = arith.constant dense<0.000000e+00> : vector<8xf32>
    %49 = vector.multi_reduction <add>, %48, %cst_23 [1] : vector<8x128xf32> to vector<8xf32>
    %50 = vector.shape_cast %49 : vector<8xf32> to vector<8x1xf32>
    %cst_24 = arith.constant 0.020833334 : f32
    %51 = vector.broadcast %cst_24 : f32 to vector<8x1xf32>
    %52 = arith.mulf %50, %51 : vector<8x1xf32>
    %cst_25 = arith.constant 9.99999974E-6 : f32
    %53 = vector.broadcast %cst_25 : f32 to vector<8x1xf32>
    %54 = arith.addf %52, %53 : vector<8x1xf32>
    %55 = math.rsqrt %54 : vector<8x1xf32>
    %56 = vector.broadcast %55 : vector<8x1xf32> to vector<8x128xf32>
    %57 = arith.mulf %44, %56 : vector<8x128xf32>
    %c1_26 = arith.constant 1 : index
    %c0_27 = arith.constant 0 : index
    %58 = vector.load %arg5[%c1_26, %c0_27] : memref<4x128xf32, #tpu.memory_space<vmem>>, vector<1x128xf32>
    %59 = vector.broadcast %58 : vector<1x128xf32> to vector<8x128xf32>
    %60 = arith.mulf %57, %59 : vector<8x128xf32>
    %c2_28 = arith.constant 2 : index
    %c0_29 = arith.constant 0 : index
    %61 = vector.load %arg5[%c2_28, %c0_29] : memref<4x128xf32, #tpu.memory_space<vmem>>, vector<1x128xf32>
    %62 = vector.broadcast %61 : vector<1x128xf32> to vector<8x128xf32>
    %63 = arith.addf %60, %62 : vector<8x128xf32>
    %cst_30 = arith.constant 0.000000e+00 : f32
    %64 = vector.broadcast %cst_30 : f32 to vector<8x128xf32>
    %65 = arith.maximumf %63, %64 : vector<8x128xf32>
    %66 = arith.truncf %65 : vector<8x128xf32> to vector<8x128xbf16>
    %c0_31 = arith.constant 0 : index
    %c0_32 = arith.constant 0 : index
    %67 = vector.load %arg6[%c0_31, %c0_32] : memref<128x128xbf16, #tpu.memory_space<vmem>>, vector<128x128xbf16>
    %cst_33 = arith.constant dense<0.000000e+00> : vector<8x128xf32>
    %68 = tpu.matmul %66, %67, %cst_33 {dimension_numbers = #tpu.dot_dimension_numbers<[1], [0], [0], [1], [0, 0, 1, 1], [], []>} : vector<8x128xbf16>, vector<128x128xbf16>, vector<8x128xf32> -> vector<8x128xf32>
    %c0_34 = arith.constant 0 : index
    %c0_35 = arith.constant 0 : index
    %69 = vector.load %arg7[%c0_34, %c0_35] : memref<1x128xf32, #tpu.memory_space<vmem>>, vector<1x128xf32>
    %70 = vector.broadcast %69 : vector<1x128xf32> to vector<8x128xf32>
    %71 = arith.addf %68, %70 : vector<8x128xf32>
    %c0_36 = arith.constant 0 : index
    %c0_37 = arith.constant 0 : index
    %72 = vector.load %arg8[%c0_36, %c0_37] : memref<8x128xf32, #tpu.memory_space<vmem>>, vector<8x128xf32>
    tpu.vector_store %arg8[%c0_36, %c0_37], %71 {strides = array<i32>} : memref<8x128xf32, #tpu.memory_space<vmem>>, vector<8x128xf32>,
    return
  }
  func.func @transform_0(%arg0: i32) -> (i32, i32) {
    %c0_i32 = arith.constant 0 : i32
    %c0_i32_0 = arith.constant 0 : i32
    return %arg0, %c0_i32 : i32, i32
  }
  func.func @transform_1(%arg0: i32) -> (i32, i32) {
    %c0_i32 = arith.constant 0 : i32
    %c0_i32_0 = arith.constant 0 : i32
    %c0_i32_1 = arith.constant 0 : i32
    return %c0_i32, %c0_i32_0 : i32, i32
  }
  func.func @transform_2(%arg0: i32) -> (i32, i32) {
    %c0_i32 = arith.constant 0 : i32
    %c0_i32_0 = arith.constant 0 : i32
    %c0_i32_1 = arith.constant 0 : i32
    return %c0_i32, %c0_i32_0 : i32, i32
  }
  func.func @transform_3(%arg0: i32) -> (i32, i32) {
    %c0_i32 = arith.constant 0 : i32
    %c0_i32_0 = arith.constant 0 : i32
    %c0_i32_1 = arith.constant 0 : i32
    return %c0_i32, %c0_i32_0 : i32, i32
  }
  func.func @transform_4(%arg0: i32) -> (i32, i32) {
    %c0_i32 = arith.constant 0 : i32
    %c0_i32_0 = arith.constant 0 : i32
    %c0_i32_1 = arith.constant 0 : i32
    return %c0_i32, %c0_i32_0 : i32, i32
  }
  func.func @transform_5(%arg0: i32) -> (i32, i32) {
    %c0_i32 = arith.constant 0 : i32
    %c0_i32_0 = arith.constant 0 : i32
    %c0_i32_1 = arith.constant 0 : i32
    return %c0_i32, %c0_i32_0 : i32, i32
  }
  func.func @transform_6(%arg0: i32) -> (i32, i32) {
    %c0_i32 = arith.constant 0 : i32
    %c0_i32_0 = arith.constant 0 : i32
    %c0_i32_1 = arith.constant 0 : i32
    return %c0_i32, %c0_i32_0 : i32, i32
  }
  func.func @transform_7(%arg0: i32) -> (i32, i32) {
    %c0_i32 = arith.constant 0 : i32
    %c0_i32_0 = arith.constant 0 : i32
    return %arg0, %c0_i32 : i32, i32
  }
}

module attributes {stable_mosaic.version = 11 : i64} {
  func.func @kernel(%arg0: i32, %arg1: memref<8x128xbf16, #tpu.memory_space<vmem>>, %arg2: memref<128x128xbf16, #tpu.memory_space<vmem>>, %arg3: memref<4x128xf32, #tpu.memory_space<vmem>>, %arg4: memref<128x128xbf16, #tpu.memory_space<vmem>>, %arg5: memref<4x128xf32, #tpu.memory_space<vmem>>, %arg6: memref<128x128xbf16, #tpu.memory_space<vmem>>, %arg7: memref<1x128xf32, #tpu.memory_space<vmem>>, %arg8: memref<8x128xf32, #tpu.memory_space<vmem>>) attributes {dimension_semantics = [#tpu.dimension_semantics<parallel>], iteration_bounds = array<i64: 1>, scalar_prefetch = 0 : i64, scratch_operands = 0 : i64, tpu.core_type = #tpu.core_type<tc>, window_params = [{transform_indices = @transform_0, window_bounds = array<i64: 8, 128>}, {pipeline_mode = #tpu.pipeline_mode<synchronous>, transform_indices = @transform_1, window_bounds = array<i64: 128, 128>}, {pipeline_mode = #tpu.pipeline_mode<synchronous>, transform_indices = @transform_2, window_bounds = array<i64: 4, 128>}, {pipeline_mode = #tpu.pipeline_mode<synchronous>, transform_indices = @transform_3, window_bounds = array<i64: 128, 128>}, {pipeline_mode = #tpu.pipeline_mode<synchronous>, transform_indices = @transform_4, window_bounds = array<i64: 4, 128>}, {pipeline_mode = #tpu.pipeline_mode<synchronous>, transform_indices = @transform_5, window_bounds = array<i64: 128, 128>}, {pipeline_mode = #tpu.pipeline_mode<synchronous>, transform_indices = @transform_6, window_bounds = array<i64: 1, 128>}, {transform_indices = @transform_7, window_bounds = array<i64: 8, 128>}]} {
    %c0 = arith.constant 0 : index
    %c0_0 = arith.constant 0 : index
    %0 = vector.load %arg1[%c0, %c0_0] : memref<8x128xbf16, #tpu.memory_space<vmem>>, vector<8x128xbf16>
    %c0_1 = arith.constant 0 : index
    %c0_2 = arith.constant 0 : index
    %1 = vector.load %arg2[%c0_1, %c0_2] : memref<128x128xbf16, #tpu.memory_space<vmem>>, vector<128x128xbf16>
    %cst = arith.constant dense<0.000000e+00> : vector<8x128xf32>
    %2 = tpu.matmul %0, %1, %cst {dimension_numbers = #tpu.dot_dimension_numbers<[1], [0], [0], [1], [0, 0, 1, 1], [], []>} : vector<8x128xbf16>, vector<128x128xbf16>, vector<8x128xf32> -> vector<8x128xf32>
    %c0_3 = arith.constant 0 : index
    %c0_4 = arith.constant 0 : index
    %3 = vector.load %arg3[%c0_3, %c0_4] : memref<4x128xf32, #tpu.memory_space<vmem>>, vector<1x128xf32>
    %4 = vector.broadcast %3 : vector<1x128xf32> to vector<8x128xf32>
    %5 = arith.addf %2, %4 : vector<8x128xf32>
    %cst_5 = arith.constant dense<0.000000e+00> : vector<8xf32>
    %6 = vector.multi_reduction <add>, %5, %cst_5 [1] : vector<8x128xf32> to vector<8xf32>
    %7 = vector.shape_cast %6 : vector<8xf32> to vector<8x1xf32>
    %cst_6 = arith.constant 1.562500e-02 : f32
    %8 = vector.broadcast %cst_6 : f32 to vector<8x1xf32>
    %9 = arith.mulf %7, %8 : vector<8x1xf32>
    %10 = vector.broadcast %9 : vector<8x1xf32> to vector<8x128xf32>
    %11 = arith.subf %5, %10 : vector<8x128xf32>
    %c3 = arith.constant 3 : index
    %c0_7 = arith.constant 0 : index
    %12 = vector.load %arg3[%c3, %c0_7] : memref<4x128xf32, #tpu.memory_space<vmem>>, vector<1x128xf32>
    %13 = vector.broadcast %12 : vector<1x128xf32> to vector<8x128xf32>
    %14 = arith.mulf %11, %13 : vector<8x128xf32>
    %15 = arith.mulf %14, %14 : vector<8x128xf32>
    %cst_8 = arith.constant dense<0.000000e+00> : vector<8xf32>
    %16 = vector.multi_reduction <add>, %15, %cst_8 [1] : vector<8x128xf32> to vector<8xf32>
    %17 = vector.shape_cast %16 : vector<8xf32> to vector<8x1xf32>
    %cst_9 = arith.constant 1.562500e-02 : f32
    %18 = vector.broadcast %cst_9 : f32 to vector<8x1xf32>
    %19 = arith.mulf %17, %18 : vector<8x1xf32>
    %cst_10 = arith.constant 9.99999974E-6 : f32
    %20 = vector.broadcast %cst_10 : f32 to vector<8x1xf32>
    %21 = arith.addf %19, %20 : vector<8x1xf32>
    %22 = math.rsqrt %21 : vector<8x1xf32>
    %23 = vector.broadcast %22 : vector<8x1xf32> to vector<8x128xf32>
    %24 = arith.mulf %11, %23 : vector<8x128xf32>
    %c1 = arith.constant 1 : index
    %c0_11 = arith.constant 0 : index
    %25 = vector.load %arg3[%c1, %c0_11] : memref<4x128xf32, #tpu.memory_space<vmem>>, vector<1x128xf32>
    %26 = vector.broadcast %25 : vector<1x128xf32> to vector<8x128xf32>
    %27 = arith.mulf %24, %26 : vector<8x128xf32>
    %c2 = arith.constant 2 : index
    %c0_12 = arith.constant 0 : index
    %28 = vector.load %arg3[%c2, %c0_12] : memref<4x128xf32, #tpu.memory_space<vmem>>, vector<1x128xf32>
    %29 = vector.broadcast %28 : vector<1x128xf32> to vector<8x128xf32>
    %30 = arith.addf %27, %29 : vector<8x128xf32>
    %cst_13 = arith.constant 0.000000e+00 : f32
    %31 = vector.broadcast %cst_13 : f32 to vector<8x128xf32>
    %32 = arith.maximumf %30, %31 : vector<8x128xf32>
    %33 = arith.truncf %32 : vector<8x128xf32> to vector<8x128xbf16>
    %c0_14 = arith.constant 0 : index
    %c0_15 = arith.constant 0 : index
    %34 = vector.load %arg4[%c0_14, %c0_15] : memref<128x128xbf16, #tpu.memory_space<vmem>>, vector<128x128xbf16>
    %cst_16 = arith.constant dense<0.000000e+00> : vector<8x128xf32>
    %35 = tpu.matmul %33, %34, %cst_16 {dimension_numbers = #tpu.dot_dimension_numbers<[1], [0], [0], [1], [0, 0, 1, 1], [], []>} : vector<8x128xbf16>, vector<128x128xbf16>, vector<8x128xf32> -> vector<8x128xf32>
    %c0_17 = arith.constant 0 : index
    %c0_18 = arith.constant 0 : index
    %36 = vector.load %arg5[%c0_17, %c0_18] : memref<4x128xf32, #tpu.memory_space<vmem>>, vector<1x128xf32>
    %37 = vector.broadcast %36 : vector<1x128xf32> to vector<8x128xf32>
    %38 = arith.addf %35, %37 : vector<8x128xf32>
    %cst_19 = arith.constant dense<0.000000e+00> : vector<8xf32>
    %39 = vector.multi_reduction <add>, %38, %cst_19 [1] : vector<8x128xf32> to vector<8xf32>
    %40 = vector.shape_cast %39 : vector<8xf32> to vector<8x1xf32>
    %cst_20 = arith.constant 0.020833334 : f32
    %41 = vector.broadcast %cst_20 : f32 to vector<8x1xf32>
    %42 = arith.mulf %40, %41 : vector<8x1xf32>
    %43 = vector.broadcast %42 : vector<8x1xf32> to vector<8x128xf32>
    %44 = arith.subf %38, %43 : vector<8x128xf32>
    %c3_21 = arith.constant 3 : index
    %c0_22 = arith.constant 0 : index
    %45 = vector.load %arg5[%c3_21, %c0_22] : memref<4x128xf32, #tpu.memory_space<vmem>>, vector<1x128xf32>
    %46 = vector.broadcast %45 : vector<1x128xf32> to vector<8x128xf32>
    %47 = arith.mulf %44, %46 : vector<8x128xf32>
    %48 = arith.mulf %47, %47 : vector<8x128xf32>
    %cst_23 = arith.constant dense<0.000000e+00> : vector<8xf32>
    %49 = vector.multi_reduction <add>, %48, %cst_23 [1] : vector<8x128xf32> to vector<8xf32>
    %50 = vector.shape_cast %49 : vector<8xf32> to vector<8x1xf32>
    %cst_24 = arith.constant 0.020833334 : f32
    %51 = vector.broadcast %cst_24 : f32 to vector<8x1xf32>
    %52 = arith.mulf %50, %51 : vector<8x1xf32>
    %cst_25 = arith.constant 9.99999974E-6 : f32
    %53 = vector.broadcast %cst_25 : f32 to vector<8x1xf32>
    %54 = arith.addf %52, %53 : vector<8x1xf32>
    %55 = math.rsqrt %54 : vector<8x1xf32>
    %56 = vector.broadcast %55 : vector<8x1xf32> to vector<8x128xf32>
    %57 = arith.mulf %44, %56 : vector<8x128xf32>
    %c1_26 = arith.constant 1 : index
    %c0_27 = arith.constant 0 : index
    %58 = vector.load %arg5[%c1_26, %c0_27] : memref<4x128xf32, #tpu.memory_space<vmem>>, vector<1x128xf32>
    %59 = vector.broadcast %58 : vector<1x128xf32> to vector<8x128xf32>
    %60 = arith.mulf %57, %59 : vector<8x128xf32>
    %c2_28 = arith.constant 2 : index
    %c0_29 = arith.constant 0 : index
    %61 = vector.load %arg5[%c2_28, %c0_29] : memref<4x128xf32, #tpu.memory_space<vmem>>, vector<1x128xf32>
    %62 = vector.broadcast %61 : vector<1x128xf32> to vector<8x128xf32>
    %63 = arith.addf %60, %62 : vector<8x128xf32>
    %cst_30 = arith.constant 0.000000e+00 : f32
    %64 = vector.broadcast %cst_30 : f32 to vector<8x128xf32>
    %65 = arith.maximumf %63, %64 : vector<8x128xf32>
    %66 = arith.truncf %65 : vector<8x128xf32> to vector<8x128xbf16>
    %c0_31 = arith.constant 0 : index
    %c0_32 = arith.constant 0 : index
    %67 = vector.load %arg6[%c0_31, %c0_32] : memref<128x128xbf16, #tpu.memory_space<vmem>>, vector<128x128xbf16>
    %cst_33 = arith.constant dense<0.000000e+00> : vector<8x128xf32>
    %68 = tpu.matmul %66, %67, %cst_33 {dimension_numbers = #tpu.dot_dimension_numbers<[1], [0], [0], [1], [0, 0, 1, 1], [], []>} : vector<8x128xbf16>, vector<128x128xbf16>, vector<8x128xf32> -> vector<8x128xf32>
    %c0_34 = arith.constant 0 : index
    %c0_35 = arith.constant 0 : index
    %69 = vector.load %arg7[%c0_34, %c0_35] : memref<1x128xf32, #tpu.memory_space<vmem>>, vector<1x128xf32>
    %70 = vector.broadcast %69 : vector<1x128xf32> to vector<8x128xf32>
    %71 = arith.addf %68, %70 : vector<8x128xf32>
    %c0_36 = arith.constant 0 : index
    %c0_37 = arith.constant 0 : index
    %72 = vector.load %arg8[%c0_36, %c0_37] : memref<8x128xf32, #tpu.memory_space<vmem>>, vector<8x128xf32>
    tpu.vector_store %arg8[%c0_36, %c0_37], %71 {strides = array<i32>} : memref<8x128xf32, #tpu.memory_space<vmem>>, vector<8x128xf32>,
    return
  }
  func.func @transform_0(%arg0: i32) -> (i32, i32) {
    %c0_i32 = arith.constant 0 : i32
    %c0_i32_0 = arith.constant 0 : i32
    return %arg0, %c0_i32 : i32, i32
  }
  func.func @transform_1(%arg0: i32) -> (i32, i32) {
    %c0_i32 = arith.constant 0 : i32
    %c0_i32_0 = arith.constant 0 : i32
    %c0_i32_1 = arith.constant 0 : i32
    return %c0_i32, %c0_i32_0 : i32, i32
  }
  func.func @transform_2(%arg0: i32) -> (i32, i32) {
    %c0_i32 = arith.constant 0 : i32
    %c0_i32_0 = arith.constant 0 : i32
    %c0_i32_1 = arith.constant 0 : i32
    return %c0_i32, %c0_i32_0 : i32, i32
  }
  func.func @transform_3(%arg0: i32) -> (i32, i32) {
    %c0_i32 = arith.constant 0 : i32
    %c0_i32_0 = arith.constant 0 : i32
    %c0_i32_1 = arith.constant 0 : i32
    return %c0_i32, %c0_i32_0 : i32, i32
  }
  func.func @transform_4(%arg0: i32) -> (i32, i32) {
    %c0_i32 = arith.constant 0 : i32
    %c0_i32_0 = arith.constant 0 : i32
    %c0_i32_1 = arith.constant 0 : i32
    return %c0_i32, %c0_i32_0 : i32, i32
  }
  func.func @transform_5(%arg0: i32) -> (i32, i32) {
    %c0_i32 = arith.constant 0 : i32
    %c0_i32_0 = arith.constant 0 : i32
    %c0_i32_1 = arith.constant 0 : i32
    return %c0_i32, %c0_i32_0 : i32, i32
  }
  func.func @transform_6(%arg0: i32) -> (i32, i32) {
    %c0_i32 = arith.constant 0 : i32
    %c0_i32_0 = arith.constant 0 : i32
    %c0_i32_1 = arith.constant 0 : i32
    return %c0_i32, %c0_i32_0 : i32, i32
  }
  func.func @transform_7(%arg0: i32) -> (i32, i32) {
    %c0_i32 = arith.constant 0 : i32
    %c0_i32_0 = arith.constant 0 : i32
    return %arg0, %c0_i32 : i32, i32
  }
}

</mosaic_0001>

<bundles_post_ra>
// kernel: fwd.1
= control target key start
LH: loop header
LB: loop body
LE: loop exit
PB: predicated region body
PF: predicated region fallthrough
CT: control target
= control target key end

     0   :  { %12 = vsyncpa [#allocation3], 0  ;;  %s840_s0 = inlined_call_operand.vmem [shape: bf16[8,128], index: 0, kind: input, shape index: {}]   ;;  %s841_s1 = inlined_call_operand.hbm [shape: bf16[128,128], index: 1, kind: input, shape index: {}]   ;;  %s842_s2 = inlined_call_operand.vmem [shape: f32[4,128], index: 2, kind: input, shape index: {}]   ;;  %s843_s3 = inlined_call_operand.hbm [shape: bf16[128,128], index: 3, kind: input, shape index: {}]   ;;  %s844_s4 = inlined_call_operand.vmem [shape: f32[4,128], index: 4, kind: input, shape index: {}]   ;;  %s845_s5 = inlined_call_operand.hbm [shape: bf16[128,128], index: 5, kind: input, shape index: {}]   ;;  %s846_s6 = inlined_call_operand.vmem [shape: f32[1,128], index: 6, kind: input, shape index: {}]   ;;  %s847_s7 = inlined_call_operand.hbm [shape: f32[8,128], index: 7, kind: output, shape index: {}]  }
   0x1   :  { %13 = vsyncpa [#allocation6], 0 }
   0x2   :  { %14 = vsyncpa [#allocation4], 0  ;;  %s720_s24 = smov [#allocation5]   ;;  %s721_s26 = smov [#allocation2]  }
   0x3   :  { %s36_s25 = sshll.u32 %s720_s24, 4  ;;  %s22_s27 = sshll.u32 %s721_s26, 4  ;;  %s37_s25 = int_to_ptr.vmem [resolvable:$true] %s36_s25  ;;  %s23_s27 = int_to_ptr.vmem [resolvable:$true] %s22_s27 }
   0x4   :  { %s642_s28 = scalar_lea.vmem %s37_s25, 1024  ;;  %p647_p1 = scmp.lt.s32.totalorder %s37_s25, %s37_s25 }
   0x5   :  { %p643_p0 = scmp.ne.s32.totalorder %s37_s25, %s642_s28  ;;  %p648_p2 = scmp.lt.s32.totalorder %s642_s28, %s642_s28 }
   0x7   :  { %p649_p3 = por %p648_p2, %p647_p1 }
   0x9   :  { %p650_p4 = pnand %p649_p3, %p643_p0 }
   0xb   :  { %653 = shalt.err (!%p650_p4)
}
   0xc   :  { %s722_s29 = smov 64   ;;  %s723_s30 = smov 4  }
   0xd   :  { %42 = dma.hbm_to_vmem [thread:$0]  %s843_s3, 1024, %s37_s25, [#allocation6], %s722_s29, %s722_s29, %s723_s30  }
   0xe   :  { %s662_s10 = scalar_lea.vmem %s23_s27, 1024  ;;  %p667_p6 = scmp.lt.s32.totalorder %s23_s27, %s23_s27 }
   0xf   :  { %p663_p5 = scmp.ne.s32.totalorder %s23_s27, %s662_s10  ;;  %p668_p7 = scmp.lt.s32.totalorder %s662_s10, %s662_s10 }
  0x11   :  { %p669_p8 = por %p668_p7, %p667_p6 }
  0x13   :  { %p670_p9 = pnand %p669_p8, %p663_p5 }
  0x15   :  { %673 = shalt.err (!%p670_p9)
}
  0x16   :  { %28 = dma.hbm_to_vmem [thread:$0]  %s841_s1, 1024, %s23_s27, [#allocation3], %s722_s29, %s722_s29, %s723_s30  }
  0x17   :  { %s724_s13 = smov [#allocation7]  }
  0x18   :  { %s50_s14 = sshll.u32 %s724_s13, 4  ;;  %s51_s14 = int_to_ptr.vmem [resolvable:$true] %s50_s14 }
  0x19   :  { %s682_s15 = scalar_lea.vmem %s51_s14, 1024  ;;  %p687_p11 = scmp.lt.s32.totalorder %s51_s14, %s51_s14 }
  0x1a   :  { %p683_p10 = scmp.ne.s32.totalorder %s51_s14, %s682_s15  ;;  %p688_p12 = scmp.lt.s32.totalorder %s682_s15, %s682_s15 }
  0x1c   :  { %p689_p13 = por %p688_p12, %p687_p11 }
  0x1e   :  { %p690_p0 = pnand %p689_p13, %p683_p10 }
  0x20   :  { %693 = shalt.err (!%p690_p0)
}
  0x21   :  { %56 = dma.hbm_to_vmem [thread:$0]  %s845_s5, 1024, %s51_s14, [#allocation6], %s722_s29, %s722_s29, %s723_s30  }
  0x22   :  { %714 = dma.done.wait [#allocation3], 1024  }
  0x23   :  { %715 = vsyncadd [#allocation3], 4294966272 }
  0x24   :  { %716 = dma.done.wait [#allocation6], 2048  }
  0x25   :  { %717 = vsyncadd [#allocation6], 4294965248  ;;  %v725_v0 = vmov 0.0   ;;  %vm726_vm0 = vmmov 0   ;;  %v606_v1 = vld [vmem:[#allocation2 + $0x38] sm:$0xff]   ;;  %v607_v2 = vld [vmem:[#allocation2 + $0x30] sm:$0xff]  }
  0x26   :  { %538 = vmatprep.subr.bf16.mxu0 %v725_v0  ;;  %554 = vmatprep.mubr.msk.bf16.mxu0 %vm726_vm0, %v725_v0  ;;  %v608_v3 = vld [vmem:[#allocation2 + $0x28] sm:$0xff]   ;;  %v609_v4 = vld [vmem:[#allocation2 + $0x20] sm:$0xff]   ;;  %v610_v5 = vld [vmem:[#allocation2 + $0x18] sm:$0xff]   ;;  %s727_s10 = smov [#allocation8]  }
  0x27   :  { %558 = vmatprep.subr.bf16.mxu1 %v725_v0  ;;  %574 = vmatprep.mubr.msk.bf16.mxu1 %vm726_vm0, %v725_v0  ;;  %v611_v6 = vld [vmem:[#allocation2 + $0x10] sm:$0xff]   ;;  %v612_v7 = vld [vmem:[#allocation2 + $0x8] sm:$0xff]   ;;  %v613_v8 = vld [vmem:[#allocation2] sm:$0xff]   ;;  %s468_s11 = sshll.u32 %s727_s10, 4  ;;  %s469_s11 = int_to_ptr.vmem [resolvable:$true] %s468_s11 }
  0x28   :  { %539 = vmatpush3.bf16.msra.mxu0 %v606_v1  ;;  %v69_v9 = vld [vmem:[%s840_s0] sm:$0xf]  ;;  %v614_v16 = vld [vmem:[#allocation5 + $0x38] sm:$0xff]   ;;  %v615_v23 = vld [vmem:[#allocation5 + $0x30] sm:$0xff]   ;;  %s694_s12 = scalar_lea.vmem %s469_s11, 128  ;;  %p699_p2 = scmp.lt.s32.totalorder %s469_s11, %s469_s11 }
  0x29   :  { %540 = vmatprep.subr.bf16.mxu0 %v725_v0  ;;  %v478_v10 = vld [vmem:[%s842_s2] ss:$0 sm:$0xff]  ;;  %559 = vmatpush3.bf16.msra.mxu1 %v614_v16  ;;  %v487_v19 = vld [vmem:[%s842_s2 + $0x3] ss:$0 sm:$0xff]  ;;  %v616_v24 = vld [vmem:[#allocation5 + $0x28] sm:$0xff]   ;;  %p695_p1 = scmp.ne.s32.totalorder %s469_s11, %s694_s12  ;;  %p700_p3 = scmp.lt.s32.totalorder %s694_s12, %s694_s12 }
  0x2a   :  { %560 = vmatprep.subr.bf16.mxu1 %v725_v0  ;;  %v617_v25 = vld [vmem:[#allocation5 + $0x20] sm:$0xff]   ;;  %v618_v26 = vld [vmem:[#allocation5 + $0x18] sm:$0xff]   ;;  %v619_v27 = vld [vmem:[#allocation5 + $0x10] sm:$0xff]  }
  0x2b   :  { %v620_v28 = vld [vmem:[#allocation5 + $0x8] sm:$0xff]   ;;  %v621_v29 = vld [vmem:[#allocation5] sm:$0xff]   ;;  %v622_v47 = vld [vmem:[#allocation7 + $0x38] sm:$0xff]   ;;  %p701_p4 = por %p700_p3, %p699_p2 }
  0x2c   :  { %541 = vmatpush3.bf16.msra.mxu0 %v607_v2  ;;  %v488_v34 = vld [vmem:[%s842_s2 + $0x1] ss:$0 sm:$0xff]  ;;  %v489_v36 = vld [vmem:[%s842_s2 + $0x2] ss:$0 sm:$0xff]  ;;  %v490_v41 = vld [vmem:[%s844_s4] ss:$0 sm:$0xff] }
  0x2d   :  { %542 = vmatprep.subr.bf16.mxu0 %v725_v0  ;;  %561 = vmatpush3.bf16.msra.mxu1 %v615_v23  ;;  %v499_v50 = vld [vmem:[%s844_s4 + $0x3] ss:$0 sm:$0xff]  ;;  %v623_v54 = vld [vmem:[#allocation7 + $0x30] sm:$0xff]   ;;  %v624_v55 = vld [vmem:[#allocation7 + $0x28] sm:$0xff]   ;;  %p702_p5 = pnand %p701_p4, %p695_p1 }
  0x2e   :  { %562 = vmatprep.subr.bf16.mxu1 %v725_v0  ;;  %v625_v56 = vld [vmem:[#allocation7 + $0x20] sm:$0xff]   ;;  %v626_v57 = vld [vmem:[#allocation7 + $0x18] sm:$0xff]   ;;  %v627_v58 = vld [vmem:[#allocation7 + $0x10] sm:$0xff]  }
  0x2f   :  { %v628_v59 = vld [vmem:[#allocation7 + $0x8] sm:$0xff]   ;;  %v629_v60 = vld [vmem:[#allocation7] sm:$0xff]  }
  0x30   :  { %543 = vmatpush3.bf16.msra.mxu0 %v608_v3  ;;  %v500_v2 = vld [vmem:[%s844_s4 + $0x1] ss:$0 sm:$0xff] }
  0x31   :  { %544 = vmatprep.subr.bf16.mxu0 %v725_v0  ;;  %563 = vmatpush3.bf16.msra.mxu1 %v616_v24 }
  0x32   :  { %564 = vmatprep.subr.bf16.mxu1 %v725_v0 }
  0x34   :  { %545 = vmatpush3.bf16.msra.mxu0 %v609_v4  ;;  %v501_v4 = vld [vmem:[%s844_s4 + $0x2] ss:$0 sm:$0xff] }
  0x35   :  { %546 = vmatprep.subr.bf16.mxu0 %v725_v0  ;;  %565 = vmatpush3.bf16.msra.mxu1 %v617_v25 }
  0x36   :  { %566 = vmatprep.subr.bf16.mxu1 %v725_v0 }
  0x38   :  { %547 = vmatpush3.bf16.msra.mxu0 %v610_v5 }
  0x39   :  { %548 = vmatprep.subr.bf16.mxu0 %v725_v0  ;;  %567 = vmatpush3.bf16.msra.mxu1 %v618_v26 }
  0x3a   :  { %568 = vmatprep.subr.bf16.mxu1 %v725_v0 }
  0x3c   :  { %549 = vmatpush3.bf16.msra.mxu0 %v611_v6 }
  0x3d   :  { %550 = vmatprep.subr.bf16.mxu0 %v725_v0  ;;  %569 = vmatpush3.bf16.msra.mxu1 %v619_v27 }
  0x3e   :  { %570 = vmatprep.subr.bf16.mxu1 %v725_v0 }
  0x40   :  { %551 = vmatpush3.bf16.msra.mxu0 %v612_v7 }
  0x41   :  { %552 = vmatprep.subr.bf16.mxu0 %v725_v0  ;;  %571 = vmatpush3.bf16.msra.mxu1 %v620_v28 }
  0x42   :  { %572 = vmatprep.subr.bf16.mxu1 %v725_v0 }
  0x44   :  { %553 = vmatpush3.bf16.msra.mxu0 %v613_v8 }
  0x45   :  { %578 = vmatprep.subr.bf16.mxu0 %v725_v0  ;;  %573 = vmatpush3.bf16.msra.mxu1 %v621_v29 }
  0x47   :  { %555 = vmatmul.mubr.bf16.vlgmr.msra.gmra.mxu0 %v69_v9 }
  0x48   :  { %594 = vmatprep.mubr.msk.bf16.mxu0 %vm726_vm0, %v725_v0  ;;  %579 = vmatpush3.bf16.msra.mxu0 %v622_v47 }
  0x49   :  { %580 = vmatprep.subr.bf16.mxu0 %v725_v0 }
  0x4c   :  { %581 = vmatpush3.bf16.msra.mxu0 %v623_v54 }
  0x4d   :  { %582 = vmatprep.subr.bf16.mxu0 %v725_v0 }
  0x50   :  { %583 = vmatpush3.bf16.msra.mxu0 %v624_v55 }
  0x51   :  { %584 = vmatprep.subr.bf16.mxu0 %v725_v0 }
  0x54   :  { %585 = vmatpush3.bf16.msra.mxu0 %v625_v56 }
  0x55   :  { %586 = vmatprep.subr.bf16.mxu0 %v725_v0 }
  0x58   :  { %587 = vmatpush3.bf16.msra.mxu0 %v626_v57 }
  0x59   :  { %588 = vmatprep.subr.bf16.mxu0 %v725_v0 }
  0x5c   :  { %589 = vmatpush3.bf16.msra.mxu0 %v627_v58 }
  0x5d   :  { %590 = vmatprep.subr.bf16.mxu0 %v725_v0 }
  0x60   :  { %591 = vmatpush3.bf16.msra.mxu0 %v628_v59 }
  0x61   :  { %592 = vmatprep.subr.bf16.mxu0 %v725_v0  ;;  %v502_v0 = vld [vmem:[%s846_s6] ss:$0 sm:$0xff] }
  0x64   :  { %593 = vmatpush3.bf16.msra.mxu0 %v629_v60 }
 0x107   :  { %v173_v11 = vpop.f32.mrf.mxu0 }
 0x108   :  { %v174_v12 = vadd.f32 %v478_v10, %v173_v11 }
 0x109   :  { %v556_v13 = vpop.f32.mrf.mxu0 }
 0x10a   :  { %179 = vadd.xlane.f32.xlu0 %v174_v12 }
 0x10b   :  { %v176_v14 = vpop.f32.mrf.mxu0 }
 0x10d   :  { %v557_v15 = vpop.f32.mrf.mxu0 }
 0x193   :  { %v180_v17 = vpop.xlane.xlu0 %179 }
 0x194   :  { %v181_v18 = vmul.f32 0.015625, %v180_v17 }
 0x196   :  { %v182_v20 = vsub.f32 %v174_v12, %v181_v18 }
 0x198   :  { %v188_v21 = vmul.f32 %v487_v19, %v182_v20 }
 0x19a   :  { %v189_v22 = vmul.f32 %v188_v21, %v188_v21 }
 0x19c   :  { %190 = vadd.xlane.f32.xlu0 %v189_v22 }
 0x225   :  { %v191_v30 = vpop.xlane.xlu0 %190 }
 0x226   :  { %v192_v31 = vmul.f32 0.015625, %v191_v30 }
 0x228   :  { %v193_v32 = vadd.f32 1e-05, %v192_v31 }
 0x22a   :  { %630 = vrsqrt.f32 %v193_v32 }
 0x237   :  { %v631_v33 = vpop.eup %630 }
 0x238   :  { %v195_v35 = vmul.f32 %v631_v33, %v182_v20 }
 0x23a   :  { %v201_v37 = vmul.f32 %v488_v34, %v195_v35 }
 0x23c   :  { %v207_v38 = vadd.f32 %v489_v36, %v201_v37 }
 0x23e   :  { %v208_v39 = vmax.f32 %v207_v38, 0.0 }
 0x240   :  { %v209_v40 = vpack.c.bf16 %v208_v39, %v208_v39 }
 0x242   :  { %575 = vmatmul.mubr.bf16.vlgmr.msra.gmra.mxu1 %v209_v40 }
 0x302   :  { %v313_v42 = vpop.f32.mrf.mxu1 }
 0x303   :  { %v314_v43 = vadd.f32 %v490_v41, %v313_v42 }
 0x304   :  { %v576_v44 = vpop.f32.mrf.mxu1 }
 0x305   :  { %319 = vadd.xlane.f32.xlu1 %v314_v43 }
 0x306   :  { %v316_v45 = vpop.f32.mrf.mxu1 }
 0x308   :  { %v577_v46 = vpop.f32.mrf.mxu1 }
 0x38e   :  { %v320_v48 = vpop.xlane.xlu1 %319 }
 0x38f   :  { %v321_v49 = vmul.f32 0.020833334, %v320_v48 }
 0x391   :  { %v322_v51 = vsub.f32 %v314_v43, %v321_v49 }
 0x393   :  { %v328_v52 = vmul.f32 %v499_v50, %v322_v51 }
 0x395   :  { %v329_v53 = vmul.f32 %v328_v52, %v328_v52 }
 0x397   :  { %330 = vadd.xlane.f32.xlu1 %v329_v53 }
 0x420   :  { %v331_v61 = vpop.xlane.xlu1 %330 }
 0x421   :  { %v332_v62 = vmul.f32 0.020833334, %v331_v61 }
 0x423   :  { %v333_v63 = vadd.f32 1e-05, %v332_v62 }
 0x425   :  { %632 = vrsqrt.f32 %v333_v63 }
 0x432   :  { %v633_v1 = vpop.eup %632 }
 0x433   :  { %v335_v3 = vmul.f32 %v633_v1, %v322_v51 }
 0x435   :  { %v341_v5 = vmul.f32 %v500_v2, %v335_v3 }
 0x437   :  { %v347_v6 = vadd.f32 %v501_v4, %v341_v5 }
 0x439   :  { %v348_v7 = vmax.f32 %v347_v6, 0.0 }
 0x43b   :  { %v349_v8 = vpack.c.bf16 %v348_v7, %v348_v7 }
 0x43d   :  { %595 = vmatmul.mubr.bf16.vlgmr.msra.gmra.mxu0 %v349_v8 }
 0x4fd   :  { %v455_v9 = vpop.f32.mrf.mxu0 }
 0x4fe   :  { %v456_v10 = vadd.f32 %v502_v0, %v455_v9 }
 0x4ff   :  { %v596_v11 = vpop.f32.mrf.mxu0 }
 0x500   :  { %461 = vst [vmem:[#allocation8] sm:$0xff] %v456_v10 }
 0x501   :  { %v458_v12 = vpop.f32.mrf.mxu0 }
 0x502   :  { %705 = shalt.err (!%p702_p5)
}
 0x503   :  { %471 = dma.vmem_to_hbm [thread:$0]  %s469_s11, 128, %s847_s7, [#allocation4]   ;;  %v597_v13 = vpop.f32.mrf.mxu0 }
 0x504   :  { %718 = dma.done.wait [#allocation4], 128  }
 0x505   :  { %719 = vsyncadd [#allocation4], 4294967168 }
 0x506   :  { %475 = vsyncpa [#allocation3], 1 }
 0x507   :  { %476 = vsyncpa [#allocation6], 1 }
 0x508   :  { %477 = vsyncpa [#allocation4], 1 }

// kernel: fwd.1
= control target key start
LH: loop header
LB: loop body
LE: loop exit
PB: predicated region body
PF: predicated region fallthrough
CT: control target
= control target key end

     0   :  { %12 = vsyncpa [#allocation3], 0  ;;  %s840_s0 = inlined_call_operand.vmem [shape: bf16[8,128], index: 0, kind: input, shape index: {}]   ;;  %s841_s1 = inlined_call_operand.hbm [shape: bf16[128,128], index: 1, kind: input, shape index: {}]   ;;  %s842_s2 = inlined_call_operand.vmem [shape: f32[4,128], index: 2, kind: input, shape index: {}]   ;;  %s843_s3 = inlined_call_operand.hbm [shape: bf16[128,128], index: 3, kind: input, shape index: {}]   ;;  %s844_s4 = inlined_call_operand.vmem [shape: f32[4,128], index: 4, kind: input, shape index: {}]   ;;  %s845_s5 = inlined_call_operand.hbm [shape: bf16[128,128], index: 5, kind: input, shape index: {}]   ;;  %s846_s6 = inlined_call_operand.vmem [shape: f32[1,128], index: 6, kind: input, shape index: {}]   ;;  %s847_s7 = inlined_call_operand.hbm [shape: f32[8,128], index: 7, kind: output, shape index: {}]  }
   0x1   :  { %13 = vsyncpa [#allocation6], 0 }
   0x2   :  { %14 = vsyncpa [#allocation4], 0  ;;  %s720_s24 = smov [#allocation5]   ;;  %s721_s26 = smov [#allocation2]  }
   0x3   :  { %s36_s25 = sshll.u32 %s720_s24, 4  ;;  %s22_s27 = sshll.u32 %s721_s26, 4  ;;  %s37_s25 = int_to_ptr.vmem [resolvable:$true] %s36_s25  ;;  %s23_s27 = int_to_ptr.vmem [resolvable:$true] %s22_s27 }
   0x4   :  { %s642_s28 = scalar_lea.vmem %s37_s25, 1024  ;;  %p647_p1 = scmp.lt.s32.totalorder %s37_s25, %s37_s25 }
   0x5   :  { %p643_p0 = scmp.ne.s32.totalorder %s37_s25, %s642_s28  ;;  %p648_p2 = scmp.lt.s32.totalorder %s642_s28, %s642_s28 }
   0x7   :  { %p649_p3 = por %p648_p2, %p647_p1 }
   0x9   :  { %p650_p4 = pnand %p649_p3, %p643_p0 }
   0xb   :  { %653 = shalt.err (!%p650_p4)
}
   0xc   :  { %s722_s29 = smov 64   ;;  %s723_s30 = smov 4  }
   0xd   :  { %42 = dma.hbm_to_vmem [thread:$0]  %s843_s3, 1024, %s37_s25, [#allocation6], %s722_s29, %s722_s29, %s723_s30  }
   0xe   :  { %s662_s10 = scalar_lea.vmem %s23_s27, 1024  ;;  %p667_p6 = scmp.lt.s32.totalorder %s23_s27, %s23_s27 }
   0xf   :  { %p663_p5 = scmp.ne.s32.totalorder %s23_s27, %s662_s10  ;;  %p668_p7 = scmp.lt.s32.totalorder %s662_s10, %s662_s10 }
  0x11   :  { %p669_p8 = por %p668_p7, %p667_p6 }
  0x13   :  { %p670_p9 = pnand %p669_p8, %p663_p5 }
  0x15   :  { %673 = shalt.err (!%p670_p9)
}
  0x16   :  { %28 = dma.hbm_to_vmem [thread:$0]  %s841_s1, 1024, %s23_s27, [#allocation3], %s722_s29, %s722_s29, %s723_s30  }
  0x17   :  { %s724_s13 = smov [#allocation7]  }
  0x18   :  { %s50_s14 = sshll.u32 %s724_s13, 4  ;;  %s51_s14 = int_to_ptr.vmem [resolvable:$true] %s50_s14 }
  0x19   :  { %s682_s15 = scalar_lea.vmem %s51_s14, 1024  ;;  %p687_p11 = scmp.lt.s32.totalorder %s51_s14, %s51_s14 }
  0x1a   :  { %p683_p10 = scmp.ne.s32.totalorder %s51_s14, %s682_s15  ;;  %p688_p12 = scmp.lt.s32.totalorder %s682_s15, %s682_s15 }
  0x1c   :  { %p689_p13 = por %p688_p12, %p687_p11 }
  0x1e   :  { %p690_p0 = pnand %p689_p13, %p683_p10 }
  0x20   :  { %693 = shalt.err (!%p690_p0)
}
  0x21   :  { %56 = dma.hbm_to_vmem [thread:$0]  %s845_s5, 1024, %s51_s14, [#allocation6], %s722_s29, %s722_s29, %s723_s30  }
  0x22   :  { %714 = dma.done.wait [#allocation3], 1024  }
  0x23   :  { %715 = vsyncadd [#allocation3], 4294966272 }
  0x24   :  { %716 = dma.done.wait [#allocation6], 2048  }
  0x25   :  { %717 = vsyncadd [#allocation6], 4294965248  ;;  %v725_v0 = vmov 0.0   ;;  %vm726_vm0 = vmmov 0   ;;  %v606_v1 = vld [vmem:[#allocation2 + $0x38] sm:$0xff]   ;;  %v607_v2 = vld [vmem:[#allocation2 + $0x30] sm:$0xff]  }
  0x26   :  { %538 = vmatprep.subr.bf16.mxu0 %v725_v0  ;;  %554 = vmatprep.mubr.msk.bf16.mxu0 %vm726_vm0, %v725_v0  ;;  %v608_v3 = vld [vmem:[#allocation2 + $0x28] sm:$0xff]   ;;  %v609_v4 = vld [vmem:[#allocation2 + $0x20] sm:$0xff]   ;;  %v610_v5 = vld [vmem:[#allocation2 + $0x18] sm:$0xff]   ;;  %s727_s10 = smov [#allocation8]  }
  0x27   :  { %558 = vmatprep.subr.bf16.mxu1 %v725_v0  ;;  %574 = vmatprep.mubr.msk.bf16.mxu1 %vm726_vm0, %v725_v0  ;;  %v611_v6 = vld [vmem:[#allocation2 + $0x10] sm:$0xff]   ;;  %v612_v7 = vld [vmem:[#allocation2 + $0x8] sm:$0xff]   ;;  %v613_v8 = vld [vmem:[#allocation2] sm:$0xff]   ;;  %s468_s11 = sshll.u32 %s727_s10, 4  ;;  %s469_s11 = int_to_ptr.vmem [resolvable:$true] %s468_s11 }
  0x28   :  { %539 = vmatpush3.bf16.msra.mxu0 %v606_v1  ;;  %v69_v9 = vld [vmem:[%s840_s0] sm:$0xf]  ;;  %v614_v16 = vld [vmem:[#allocation5 + $0x38] sm:$0xff]   ;;  %v615_v23 = vld [vmem:[#allocation5 + $0x30] sm:$0xff]   ;;  %s694_s12 = scalar_lea.vmem %s469_s11, 128  ;;  %p699_p2 = scmp.lt.s32.totalorder %s469_s11, %s469_s11 }
  0x29   :  { %540 = vmatprep.subr.bf16.mxu0 %v725_v0  ;;  %v478_v10 = vld [vmem:[%s842_s2] ss:$0 sm:$0xff]  ;;  %559 = vmatpush3.bf16.msra.mxu1 %v614_v16  ;;  %v487_v19 = vld [vmem:[%s842_s2 + $0x3] ss:$0 sm:$0xff]  ;;  %v616_v24 = vld [vmem:[#allocation5 + $0x28] sm:$0xff]   ;;  %p695_p1 = scmp.ne.s32.totalorder %s469_s11, %s694_s12  ;;  %p700_p3 = scmp.lt.s32.totalorder %s694_s12, %s694_s12 }
  0x2a   :  { %560 = vmatprep.subr.bf16.mxu1 %v725_v0  ;;  %v617_v25 = vld [vmem:[#allocation5 + $0x20] sm:$0xff]   ;;  %v618_v26 = vld [vmem:[#allocation5 + $0x18] sm:$0xff]   ;;  %v619_v27 = vld [vmem:[#allocation5 + $0x10] sm:$0xff]  }
  0x2b   :  { %v620_v28 = vld [vmem:[#allocation5 + $0x8] sm:$0xff]   ;;  %v621_v29 = vld [vmem:[#allocation5] sm:$0xff]   ;;  %v622_v47 = vld [vmem:[#allocation7 + $0x38] sm:$0xff]   ;;  %p701_p4 = por %p700_p3, %p699_p2 }
  0x2c   :  { %541 = vmatpush3.bf16.msra.mxu0 %v607_v2  ;;  %v488_v34 = vld [vmem:[%s842_s2 + $0x1] ss:$0 sm:$0xff]  ;;  %v489_v36 = vld [vmem:[%s842_s2 + $0x2] ss:$0 sm:$0xff]  ;;  %v490_v41 = vld [vmem:[%s844_s4] ss:$0 sm:$0xff] }
  0x2d   :  { %542 = vmatprep.subr.bf16.mxu0 %v725_v0  ;;  %561 = vmatpush3.bf16.msra.mxu1 %v615_v23  ;;  %v499_v50 = vld [vmem:[%s844_s4 + $0x3] ss:$0 sm:$0xff]  ;;  %v623_v54 = vld [vmem:[#allocation7 + $0x30] sm:$0xff]   ;;  %v624_v55 = vld [vmem:[#allocation7 + $0x28] sm:$0xff]   ;;  %p702_p5 = pnand %p701_p4, %p695_p1 }
  0x2e   :  { %562 = vmatprep.subr.bf16.mxu1 %v725_v0  ;;  %v625_v56 = vld [vmem:[#allocation7 + $0x20] sm:$0xff]   ;;  %v626_v57 = vld [vmem:[#allocation7 + $0x18] sm:$0xff]   ;;  %v627_v58 = vld [vmem:[#allocation7 + $0x10] sm:$0xff]  }
  0x2f   :  { %v628_v59 = vld [vmem:[#allocation7 + $0x8] sm:$0xff]   ;;  %v629_v60 = vld [vmem:[#allocation7] sm:$0xff]  }
  0x30   :  { %543 = vmatpush3.bf16.msra.mxu0 %v608_v3  ;;  %v500_v2 = vld [vmem:[%s844_s4 + $0x1] ss:$0 sm:$0xff] }
  0x31   :  { %544 = vmatprep.subr.bf16.mxu0 %v725_v0  ;;  %563 = vmatpush3.bf16.msra.mxu1 %v616_v24 }
  0x32   :  { %564 = vmatprep.subr.bf16.mxu1 %v725_v0 }
  0x34   :  { %545 = vmatpush3.bf16.msra.mxu0 %v609_v4  ;;  %v501_v4 = vld [vmem:[%s844_s4 + $0x2] ss:$0 sm:$0xff] }
  0x35   :  { %546 = vmatprep.subr.bf16.mxu0 %v725_v0  ;;  %565 = vmatpush3.bf16.msra.mxu1 %v617_v25 }
  0x36   :  { %566 = vmatprep.subr.bf16.mxu1 %v725_v0 }
  0x38   :  { %547 = vmatpush3.bf16.msra.mxu0 %v610_v5 }
  0x39   :  { %548 = vmatprep.subr.bf16.mxu0 %v725_v0  ;;  %567 = vmatpush3.bf16.msra.mxu1 %v618_v26 }
  0x3a   :  { %568 = vmatprep.subr.bf16.mxu1 %v725_v0 }
  0x3c   :  { %549 = vmatpush3.bf16.msra.mxu0 %v611_v6 }
  0x3d   :  { %550 = vmatprep.subr.bf16.mxu0 %v725_v0  ;;  %569 = vmatpush3.bf16.msra.mxu1 %v619_v27 }
  0x3e   :  { %570 = vmatprep.subr.bf16.mxu1 %v725_v0 }
  0x40   :  { %551 = vmatpush3.bf16.msra.mxu0 %v612_v7 }
  0x41   :  { %552 = vmatprep.subr.bf16.mxu0 %v725_v0  ;;  %571 = vmatpush3.bf16.msra.mxu1 %v620_v28 }
  0x42   :  { %572 = vmatprep.subr.bf16.mxu1 %v725_v0 }
  0x44   :  { %553 = vmatpush3.bf16.msra.mxu0 %v613_v8 }
  0x45   :  { %578 = vmatprep.subr.bf16.mxu0 %v725_v0  ;;  %573 = vmatpush3.bf16.msra.mxu1 %v621_v29 }
  0x47   :  { %555 = vmatmul.mubr.bf16.vlgmr.msra.gmra.mxu0 %v69_v9 }
  0x48   :  { %594 = vmatprep.mubr.msk.bf16.mxu0 %vm726_vm0, %v725_v0  ;;  %579 = vmatpush3.bf16.msra.mxu0 %v622_v47 }
  0x49   :  { %580 = vmatprep.subr.bf16.mxu0 %v725_v0 }
  0x4c   :  { %581 = vmatpush3.bf16.msra.mxu0 %v623_v54 }
  0x4d   :  { %582 = vmatprep.subr.bf16.mxu0 %v725_v0 }
  0x50   :  { %583 = vmatpush3.bf16.msra.mxu0 %v624_v55 }
  0x51   :  { %584 = vmatprep.subr.bf16.mxu0 %v725_v0 }
  0x54   :  { %585 = vmatpush3.bf16.msra.mxu0 %v625_v56 }
  0x55   :  { %586 = vmatprep.subr.bf16.mxu0 %v725_v0 }
  0x58   :  { %587 = vmatpush3.bf16.msra.mxu0 %v626_v57 }
  0x59   :  { %588 = vmatprep.subr.bf16.mxu0 %v725_v0 }
  0x5c   :  { %589 = vmatpush3.bf16.msra.mxu0 %v627_v58 }
  0x5d   :  { %590 = vmatprep.subr.bf16.mxu0 %v725_v0 }
  0x60   :  { %591 = vmatpush3.bf16.msra.mxu0 %v628_v59 }
  0x61   :  { %592 = vmatprep.subr.bf16.mxu0 %v725_v0  ;;  %v502_v0 = vld [vmem:[%s846_s6] ss:$0 sm:$0xff] }
  0x64   :  { %593 = vmatpush3.bf16.msra.mxu0 %v629_v60 }
 0x107   :  { %v173_v11 = vpop.f32.mrf.mxu0 }
 0x108   :  { %v174_v12 = vadd.f32 %v478_v10, %v173_v11 }
 0x109   :  { %v556_v13 = vpop.f32.mrf.mxu0 }
 0x10a   :  { %179 = vadd.xlane.f32.xlu0 %v174_v12 }
 0x10b   :  { %v176_v14 = vpop.f32.mrf.mxu0 }
 0x10d   :  { %v557_v15 = vpop.f32.mrf.mxu0 }
 0x193   :  { %v180_v17 = vpop.xlane.xlu0 %179 }
 0x194   :  { %v181_v18 = vmul.f32 0.015625, %v180_v17 }
 0x196   :  { %v182_v20 = vsub.f32 %v174_v12, %v181_v18 }
 0x198   :  { %v188_v21 = vmul.f32 %v487_v19, %v182_v20 }
 0x19a   :  { %v189_v22 = vmul.f32 %v188_v21, %v188_v21 }
 0x19c   :  { %190 = vadd.xlane.f32.xlu0 %v189_v22 }
 0x225   :  { %v191_v30 = vpop.xlane.xlu0 %190 }
 0x226   :  { %v192_v31 = vmul.f32 0.015625, %v191_v30 }
 0x228   :  { %v193_v32 = vadd.f32 1e-05, %v192_v31 }
 0x22a   :  { %630 = vrsqrt.f32 %v193_v32 }
 0x237   :  { %v631_v33 = vpop.eup %630 }
 0x238   :  { %v195_v35 = vmul.f32 %v631_v33, %v182_v20 }
 0x23a   :  { %v201_v37 = vmul.f32 %v488_v34, %v195_v35 }
 0x23c   :  { %v207_v38 = vadd.f32 %v489_v36, %v201_v37 }
 0x23e   :  { %v208_v39 = vmax.f32 %v207_v38, 0.0 }
 0x240   :  { %v209_v40 = vpack.c.bf16 %v208_v39, %v208_v39 }
 0x242   :  { %575 = vmatmul.mubr.bf16.vlgmr.msra.gmra.mxu1 %v209_v40 }
 0x302   :  { %v313_v42 = vpop.f32.mrf.mxu1 }
 0x303   :  { %v314_v43 = vadd.f32 %v490_v41, %v313_v42 }
 0x304   :  { %v576_v44 = vpop.f32.mrf.mxu1 }
 0x305   :  { %319 = vadd.xlane.f32.xlu1 %v314_v43 }
 0x306   :  { %v316_v45 = vpop.f32.mrf.mxu1 }
 0x308   :  { %v577_v46 = vpop.f32.mrf.mxu1 }
 0x38e   :  { %v320_v48 = vpop.xlane.xlu1 %319 }
 0x38f   :  { %v321_v49 = vmul.f32 0.020833334, %v320_v48 }
 0x391   :  { %v322_v51 = vsub.f32 %v314_v43, %v321_v49 }
 0x393   :  { %v328_v52 = vmul.f32 %v499_v50, %v322_v51 }
 0x395   :  { %v329_v53 = vmul.f32 %v328_v52, %v328_v52 }
 0x397   :  { %330 = vadd.xlane.f32.xlu1 %v329_v53 }
 0x420   :  { %v331_v61 = vpop.xlane.xlu1 %330 }
 0x421   :  { %v332_v62 = vmul.f32 0.020833334, %v331_v61 }
 0x423   :  { %v333_v63 = vadd.f32 1e-05, %v332_v62 }
 0x425   :  { %632 = vrsqrt.f32 %v333_v63 }
 0x432   :  { %v633_v1 = vpop.eup %632 }
 0x433   :  { %v335_v3 = vmul.f32 %v633_v1, %v322_v51 }
 0x435   :  { %v341_v5 = vmul.f32 %v500_v2, %v335_v3 }
 0x437   :  { %v347_v6 = vadd.f32 %v501_v4, %v341_v5 }
 0x439   :  { %v348_v7 = vmax.f32 %v347_v6, 0.0 }
 0x43b   :  { %v349_v8 = vpack.c.bf16 %v348_v7, %v348_v7 }
 0x43d   :  { %595 = vmatmul.mubr.bf16.vlgmr.msra.gmra.mxu0 %v349_v8 }
 0x4fd   :  { %v455_v9 = vpop.f32.mrf.mxu0 }
 0x4fe   :  { %v456_v10 = vadd.f32 %v502_v0, %v455_v9 }
 0x4ff   :  { %v596_v11 = vpop.f32.mrf.mxu0 }
 0x500   :  { %461 = vst [vmem:[#allocation8] sm:$0xff] %v456_v10 }
 0x501   :  { %v458_v12 = vpop.f32.mrf.mxu0 }
 0x502   :  { %705 = shalt.err (!%p702_p5)
}
 0x503   :  { %471 = dma.vmem_to_hbm [thread:$0]  %s469_s11, 128, %s847_s7, [#allocation4]   ;;  %v597_v13 = vpop.f32.mrf.mxu0 }
 0x504   :  { %718 = dma.done.wait [#allocation4], 128  }
 0x505   :  { %719 = vsyncadd [#allocation4], 4294967168 }
 0x506   :  { %475 = vsyncpa [#allocation3], 1 }
 0x507   :  { %476 = vsyncpa [#allocation6], 1 }
 0x508   :  { %477 = vsyncpa [#allocation4], 1 }

</bundles_post_ra>
